<compile_context>
chip_gen: v5e
topology: v5e:2x2
jax: 0.10.0
libtpu: 0.0.40
codegen_flags: <defaults>
</compile_context>

<pallas_src>
import functools

import jax
import jax.numpy as jnp
import numpy as np
from jax.experimental import pallas as pl
from jax.experimental.pallas import tpu as pltpu

_LANE = 128


def _round_up(x: int, m: int) -> int:
    return -(-x // m) * m


def _default_num_parts() -> int:
    """1 grid 'part' per TensorCore that can independently issue DMAs."""
    try:
        dev = jax.devices()[0]
        if dev.platform != "tpu":
            return 1
        kind = dev.device_kind.lower()
    except Exception:  # pragma: no cover - defensive
        return 1
    # Single-TensorCore generations ("lite" chips): v5e / v6e (and v2/v3 cores
    # are exposed as one device per core).  Everything else (v4/v5p megacore,
    # v7x dual-TC) benefits from 2 parallel parts.
    single_tc = ("v2", "v3", "v5 lite", "v5e", "v5litepod", "v6 lite", "v6e")
    if any(s in kind for s in single_tc):
        return 1
    return 2


def _evidential_nll_kernel(x_ref, out_ref, acc_ref, *, coeff, batch,
                           tile_rows, tiles_per_part, approx_recip):
    # x_ref  : (4, tile_rows, 128) native-dtype tile [gamma, nu, beta, y]
    # out_ref: (1, 1) f32 SMEM -- partial sum for this part
    # acc_ref: (8, 128) f32 VMEM -- single-vreg accumulator (lives across the
    #          inner reduction axis)
    i = pl.program_id(1)

    @pl.when(i == 0)
    def _init():
        acc_ref[...] = jnp.zeros_like(acc_ref)

    # Cast to f32 after the (possibly bf16) load; all math is f32.
    gamma = x_ref[0].astype(jnp.float32)
    nu = x_ref[1].astype(jnp.float32)
    beta = x_ref[2].astype(jnp.float32)
    y = x_ref[3].astype(jnp.float32)

    error = gamma - y
    nu_eps = nu + 1e-9
    if approx_recip:
        # EUP vrcp path (~2^-12 rel error) -- opt in if EUP is the binding slot.
        inv_var = nu_eps * pl.reciprocal(beta, approx=True)
    else:
        inv_var = nu_eps / beta                      # one divide per element
    # loss = log(var) + (1 + c*nu) * err^2 / var
    #      = (1 + c*nu) * err^2 * inv_var - log(inv_var)   (one log per element)
    loss = (1.0 + coeff * nu) * (error * error) * inv_var - jnp.log(inv_var)

    # Mask padded elements (pure VPU; robust regardless of pad values /
    # approximate reciprocal on the pad lanes).
    tile_idx = pl.program_id(0) * tiles_per_part + i
    row = jax.lax.broadcasted_iota(jnp.int32, (tile_rows, _LANE), 0)
    lane = jax.lax.broadcasted_iota(jnp.int32, (tile_rows, _LANE), 1)
    gidx = (tile_idx * tile_rows + row) * _LANE + lane
    loss = jnp.where(gidx < batch, loss, 0.0)

    # Fold into a one-vreg accumulator with cross-vreg VPU adds (no XLU, no
    # big-accumulator RMW traffic).
    acc_ref[...] += loss.reshape(tile_rows // 8, 8, _LANE).sum(axis=0)

    @pl.when(i == pl.num_programs(1) - 1)
    def _finalize():
        out_ref[0, 0] = jnp.sum(acc_ref[...])        # single small XLU reduce


def evidential_nll(logits: jax.Array, y_true: jax.Array, coeff: float = 0.01,
                   *, tile_rows: int = 2048, num_parts: int | None = None,
                   approx_recip: bool = False) -> jax.Array:
    """logits: (b,4), y_true: (b,1) -> scalar f32 mean evidential NLL.

    Precondition (same as the reference): beta > 0 and nu > -1e-9, otherwise
    the result contains inf/nan exactly like the PyTorch module.
    """
    assert logits.ndim == 2 and logits.shape[1] == 4
    assert y_true.ndim == 2 and y_true.shape[1] == 1
    assert logits.shape[0] == y_true.shape[0]
    b = logits.shape[0]

    # Streams keep the native (promoted) input dtype -> bf16 inputs halve HBM
    # bytes; the kernel upcasts to f32 after the load.
    dt = jnp.promote_types(logits.dtype, y_true.dtype)
    if not jnp.issubdtype(dt, jnp.floating):
        dt = jnp.dtype(jnp.float32)
    itemsize = jnp.dtype(dt).itemsize
    sub = max(8, 32 // itemsize)          # sublane packing: 8 f32 / 16 bf16

    # Lane rows of 128 needed to hold the batch.
    r0 = max(1, -(-b // _LANE))

    parts = _default_num_parts() if num_parts is None else max(1, int(num_parts))

    # Cap the tile so the double-buffered (4, tile_rows, 128) block fits every
    # generation's scoped-VMEM budget (v5e 16 MiB default, v7x 64 MiB physical).
    tr_cap = max(sub, ((24 << 20) // (2 * 4 * _LANE * itemsize)) // sub * sub)
    tr = _round_up(min(max(int(tile_rows), sub), tr_cap), sub)

    total_tiles = -(-r0 // tr)
    if total_tiles < parts:               # not enough work to split across TCs
        parts = 1
    tiles_per_part = -(-total_tiles // parts)
    # Bound padding waste: shrink the tile to just cover the data.
    tr = _round_up(-(-r0 // (parts * tiles_per_part)), sub)
    rows = parts * tiles_per_part * tr
    n_pad = rows * _LANE

    gamma = logits[:, 0].astype(dt)
    nu = logits[:, 1].astype(dt)
    beta = logits[:, 3].astype(dt)        # alpha (col 2) is never materialized
    y = y_true[:, 0].astype(dt)

    # TODO(synk): preferred fix per review -- have the producer emit
    # gamma/nu/beta/y already planar & lane-dense so this single fused pad +
    # stack copy disappears and the kernel reads the producer's buffers.
    def prep(x, pad_value):
        # Pad values keep the math finite on padded lanes (they are masked
        # out in-kernel anyway).
        return jnp.pad(x, (0, n_pad - b), constant_values=pad_value)

    stacked = jnp.stack(
        [prep(gamma, 0.0), prep(nu, 1.0), prep(beta, 1.0), prep(y, 0.0)],
        axis=0).reshape(4, rows, _LANE)

    kernel = functools.partial(
        _evidential_nll_kernel, coeff=float(coeff), batch=b, tile_rows=tr,
        tiles_per_part=tiles_per_part, approx_recip=bool(approx_recip))

    block_bytes = 4 * tr * _LANE * itemsize
    vmem_limit = int(min(max(2 * block_bytes + (2 << 20), 8 << 20), 30 << 20))

    partials = pl.pallas_call(
        kernel,
        out_shape=jax.ShapeDtypeStruct((parts, 1), jnp.float32),
        grid=(parts, tiles_per_part),
        in_specs=[pl.BlockSpec((4, tr, _LANE),
                               lambda p, i: (0, p * tiles_per_part + i, 0))],
        out_specs=pl.BlockSpec((1, 1), lambda p, i: (p, 0),
                               memory_space=pltpu.SMEM),
        scratch_shapes=[pltpu.VMEM((8, _LANE), jnp.float32)],
        compiler_params=pltpu.CompilerParams(
            dimension_semantics=("parallel", "arbitrary"),
            vmem_limit_bytes=vmem_limit),
    )(stacked)

    # Padded lanes are masked to exactly 0; divide by the true batch size.
    return jnp.sum(partials) / jnp.float32(b)


def _reference(logits, y_true, coeff=0.01):
    gamma = logits[:, 0:1]
    nu = logits[:, 1:2]
    beta = logits[:, 3:4]
    error = gamma - y_true
    var = beta / (nu + 1e-9)
    loss = jnp.log(var) + (1.0 + coeff * nu) * error**2 / var
    return jnp.mean(loss)


if __name__ == "__main__":
    key = jax.random.PRNGKey(0)
    k1, k2, k3, k4 = jax.random.split(key, 4)

    # Primary small test (b=8), f32. nu / beta must be positive (the module
    # assumes positively-constrained evidential parameters).
    b = 8
    logits = jax.random.uniform(k1, (b, 4), jnp.float32, minval=0.1, maxval=2.0)
    y_true = jax.random.normal(k2, (b, 1), jnp.float32)

    out = jax.block_until_ready(evidential_nll(logits, y_true, coeff=0.01))
    ref = _reference(logits, y_true, coeff=0.01)
    np.testing.assert_allclose(np.asarray(out), np.asarray(ref), rtol=1e-5, atol=1e-5)

    # Non-multiple batch + tiny tiles: exercises padding/masking, multi-step
    # accumulation and (on multi-TC chips) the outer "parallel" axis.
    b2 = 3000
    logits2 = jax.random.uniform(k3, (b2, 4), jnp.float32, minval=0.1, maxval=2.0)
    y_true2 = jax.random.normal(k4, (b2, 1), jnp.float32)

    out2 = jax.block_until_ready(
        evidential_nll(logits2, y_true2, coeff=0.01, tile_rows=8))
    ref2 = _reference(logits2, y_true2, coeff=0.01)
    np.testing.assert_allclose(np.asarray(out2), np.asarray(ref2), rtol=1e-4, atol=1e-5)

    # Native-dtype (bf16) streams: the kernel upcasts after the load, so it
    # matches an f32 reference evaluated on the bf16-rounded inputs.
    lb = logits2.astype(jnp.bfloat16)
    yb = y_true2.astype(jnp.bfloat16)
    out3 = jax.block_until_ready(evidential_nll(lb, yb, coeff=0.01))
    ref3 = _reference(lb.astype(jnp.float32), yb.astype(jnp.float32), coeff=0.01)
    np.testing.assert_allclose(np.asarray(out3), np.asarray(ref3), rtol=1e-5, atol=1e-5)

    # Optional EUP-saving path: approximate reciprocal (looser tolerance).
    out4 = jax.block_until_ready(
        evidential_nll(logits2, y_true2, coeff=0.01, approx_recip=True))
    np.testing.assert_allclose(np.asarray(out4), np.asarray(ref2), rtol=5e-3, atol=5e-3)

    print("KERNEL_OK")
</pallas_src>

<mosaic_0001>
module attributes {stable_mosaic.version = 11 : i64} {
  func.func @_evidential_nll_kernel(%arg0: i32, %arg1: i32, %arg2: memref<4x8x128xf32, #tpu.memory_space<vmem>>, %arg3: memref<1x1xf32, #tpu.memory_space<smem>>, %arg4: memref<8x128xf32, #tpu.memory_space<vmem>>) attributes {dimension_semantics = [#tpu.dimension_semantics<parallel>, #tpu.dimension_semantics<arbitrary>], iteration_bounds = array<i64: 1, 1>, scalar_prefetch = 0 : i64, scratch_operands = 1 : i64, tpu.core_type = #tpu.core_type<tc>, window_params = [{transform_indices = @transform_0, window_bounds = array<i64: 4, 8, 128>}, {transform_indices = @transform_1, window_bounds = array<i64: 1, 1>}]} {
    %c0_i32 = arith.constant 0 : i32
    %0 = arith.cmpi eq, %arg1, %c0_i32 : i32
    %1 = arith.extui %0 : i1 to i32
    %c0_i32_0 = arith.constant 0 : i32
    %2 = arith.cmpi ne, %1, %c0_i32_0 : i32
    scf.if %2 {
      %cst_20 = arith.constant 0.000000e+00 : f32
      %46 = vector.broadcast %cst_20 : f32 to vector<8x128xf32>
      %c0_21 = arith.constant 0 : index
      %c0_22 = arith.constant 0 : index
      %47 = vector.load %arg4[%c0_21, %c0_22] : memref<8x128xf32, #tpu.memory_space<vmem>>, vector<8x128xf32>
      tpu.vector_store %arg4[%c0_21, %c0_22], %46 {strides = array<i32>} : memref<8x128xf32, #tpu.memory_space<vmem>>, vector<8x128xf32>,
    } else {
    }
    %c0 = arith.constant 0 : index
    %c0_1 = arith.constant 0 : index
    %c0_2 = arith.constant 0 : index
    %3 = vector.load %arg2[%c0, %c0_1, %c0_2] : memref<4x8x128xf32, #tpu.memory_space<vmem>>, vector<1x8x128xf32>
    %4 = vector.shape_cast %3 : vector<1x8x128xf32> to vector<8x128xf32>
    %c1 = arith.constant 1 : index
    %c0_3 = arith.constant 0 : index
    %c0_4 = arith.constant 0 : index
    %5 = vector.load %arg2[%c1, %c0_3, %c0_4] : memref<4x8x128xf32, #tpu.memory_space<vmem>>, vector<1x8x128xf32>
    %6 = vector.shape_cast %5 : vector<1x8x128xf32> to vector<8x128xf32>
    %c2 = arith.constant 2 : index
    %c0_5 = arith.constant 0 : index
    %c0_6 = arith.constant 0 : index
    %7 = vector.load %arg2[%c2, %c0_5, %c0_6] : memref<4x8x128xf32, #tpu.memory_space<vmem>>, vector<1x8x128xf32>
    %8 = vector.shape_cast %7 : vector<1x8x128xf32> to vector<8x128xf32>
    %c3 = arith.constant 3 : index
    %c0_7 = arith.constant 0 : index
    %c0_8 = arith.constant 0 : index
    %9 = vector.load %arg2[%c3, %c0_7, %c0_8] : memref<4x8x128xf32, #tpu.memory_space<vmem>>, vector<1x8x128xf32>
    %10 = vector.shape_cast %9 : vector<1x8x128xf32> to vector<8x128xf32>
    %11 = arith.subf %4, %10 : vector<8x128xf32>
    %cst = arith.constant 9.99999971E-10 : f32
    %12 = vector.broadcast %cst : f32 to vector<8x128xf32>
    %13 = arith.addf %6, %12 : vector<8x128xf32>
    %14 = arith.divf %13, %8 : vector<8x128xf32>
    %cst_9 = arith.constant 0.00999999977 : f32
    %15 = vector.broadcast %cst_9 : f32 to vector<8x128xf32>
    %16 = arith.mulf %15, %6 : vector<8x128xf32>
    %cst_10 = arith.constant 1.000000e+00 : f32
    %17 = vector.broadcast %cst_10 : f32 to vector<8x128xf32>
    %18 = arith.addf %17, %16 : vector<8x128xf32>
    %19 = arith.mulf %11, %11 : vector<8x128xf32>
    %20 = arith.mulf %18, %19 : vector<8x128xf32>
    %21 = arith.mulf %20, %14 : vector<8x128xf32>
    %22 = math.log %14 : vector<8x128xf32>
    %23 = arith.subf %21, %22 : vector<8x128xf32>
    %c1_i32 = arith.constant 1 : i32
    %24 = arith.muli %arg0, %c1_i32 : i32
    %25 = arith.addi %24, %arg1 : i32
    %26 = tpu.iota {dimensions = array<i32: 0>} : vector<8x128xi32>
    %27 = tpu.iota {dimensions = array<i32: 1>} : vector<8x128xi32>
    %c8_i32 = arith.constant 8 : i32
    %28 = arith.muli %25, %c8_i32 : i32
    %29 = vector.broadcast %28 : i32 to vector<8x128xi32>
    %30 = arith.addi %29, %26 : vector<8x128xi32>
    %c128_i32 = arith.constant 128 : i32
    %31 = vector.broadcast %c128_i32 : i32 to vector<8x128xi32>
    %32 = arith.muli %30, %31 : vector<8x128xi32>
    %33 = arith.addi %32, %27 : vector<8x128xi32>
    %c8_i32_11 = arith.constant 8 : i32
    %34 = vector.broadcast %c8_i32_11 : i32 to vector<8x128xi32>
    %35 = arith.cmpi slt, %33, %34 : vector<8x128xi32>
    %cst_12 = arith.constant 0.000000e+00 : f32
    %36 = vector.broadcast %cst_12 : f32 to vector<8x128xf32>
    %37 = arith.select %35, %23, %36 : vector<8x128xi1>, vector<8x128xf32>
    %c0_13 = arith.constant 0 : index
    %c0_14 = arith.constant 0 : index
    %38 = vector.load %arg4[%c0_13, %c0_14] : memref<8x128xf32, #tpu.memory_space<vmem>>, vector<8x128xf32>
    %39 = vector.shape_cast %37 : vector<8x128xf32> to vector<1x8x128xf32>
    %cst_15 = arith.constant dense<0.000000e+00> : vector<8x128xf32>
    %40 = vector.multi_reduction <add>, %39, %cst_15 [0] : vector<1x8x128xf32> to vector<8x128xf32>
    %41 = arith.addf %38, %40 : vector<8x128xf32>
    %c0_16 = arith.constant 0 : index
    %c0_17 = arith.constant 0 : index
    %42 = vector.load %arg4[%c0_16, %c0_17] : memref<8x128xf32, #tpu.memory_space<vmem>>, vector<8x128xf32>
    tpu.vector_store %arg4[%c0_16, %c0_17], %41 {strides = array<i32>} : memref<8x128xf32, #tpu.memory_space<vmem>>, vector<8x128xf32>,
    %c0_i32_18 = arith.constant 0 : i32
    %43 = arith.cmpi eq, %arg1, %c0_i32_18 : i32
    %44 = arith.extui %43 : i1 to i32
    %c0_i32_19 = arith.constant 0 : i32
    %45 = arith.cmpi ne, %44, %c0_i32_19 : i32
    scf.if %45 {
      %c0_20 = arith.constant 0 : index
      %c0_21 = arith.constant 0 : index
      %46 = vector.load %arg4[%c0_20, %c0_21] : memref<8x128xf32, #tpu.memory_space<vmem>>, vector<8x128xf32>
      %47 = vector.shape_cast %46 : vector<8x128xf32> to vector<1x8x128xf32>
      %cst_22 = arith.constant dense<0.000000e+00> : vector<1xf32>
      %48 = vector.multi_reduction <add>, %47, %cst_22 [1, 2] : vector<1x8x128xf32> to vector<1xf32>
      %49 = vector.shape_cast %48 : vector<1xf32> to vector<1x1x1xf32>
      %50 = vector.extract %49[0, 0, 0] : f32 from vector<1x1x1xf32>
      %c0_23 = arith.constant 0 : index
      %c0_24 = arith.constant 0 : index
      %51 = memref.load %arg3[%c0_23, %c0_24] : memref<1x1xf32, #tpu.memory_space<smem>>
      memref.store %50, %arg3[%c0_23, %c0_24] : memref<1x1xf32, #tpu.memory_space<smem>>
    } else {
    }
    return
  }
  func.func @transform_0(%arg0: i32, %arg1: i32) -> (i32, i32, i32) {
    %c1_i32 = arith.constant 1 : i32
    %0 = arith.muli %arg0, %c1_i32 : i32
    %1 = arith.addi %0, %arg1 : i32
    %c0_i32 = arith.constant 0 : i32
    %c0_i32_0 = arith.constant 0 : i32
    %c0_i32_1 = arith.constant 0 : i32
    return %c0_i32, %1, %c0_i32_0 : i32, i32, i32
  }
  func.func @transform_1(%arg0: i32, %arg1: i32) -> (i32, i32) {
    %c0_i32 = arith.constant 0 : i32
    %c0_i32_0 = arith.constant 0 : i32
    return %arg0, %c0_i32 : i32, i32
  }
}

</mosaic_0001>

<bundles_post_ra>
// kernel: tpu_custom_call.1
= control target key start
LH: loop header
LB: loop body
LE: loop exit
PB: predicated region body
PF: predicated region fallthrough
CT: control target
= control target key end

     0   :  { %6 = vsyncpa [#allocation4], 0  ;;  %s183_s0 = inlined_call_operand.hbm [shape: f32[4,8,128], index: 0, kind: input, shape index: {}]   ;;  %s184_s1 = inlined_call_operand.hbm [shape: f32[1,1], index: 1, kind: output, shape index: {}]  }
   0x1   :  { %7 = vsyncpa [#allocation5], 0  ;;  %s15_s8 = sshll.u32 %s183_s0, 4  ;;  %s163_s9 = smov [#allocation3]   ;;  %s16_s8 = int_to_ptr.hbm [resolvable:$true] %s15_s8 }
   0x2   :  { %s17_s10 = sshll.u32 %s163_s9, 4  ;;  %s164_s11 = smov 128   ;;  %s18_s10 = int_to_ptr.vmem [resolvable:$true] %s17_s10 }
   0x3   :  { %s165_s12 = smov 8  }
   0x4   :  { %23 = dma.hbm_to_vmem [thread:$0]  %s16_s8, 512, %s18_s10, [#allocation4], %s164_s11, %s164_s11, %s165_s12  }
   0x5   :  { %159 = dma.done.wait [#allocation4], 512  }
   0x6   :  { %160 = vsyncadd [#allocation4], 4294966784  ;;  %v38_v0 = vld [vmem:[#allocation3 + $0x10] sm:$0xff]  ;;  %v34_v4 = vld [vmem:[#allocation3] sm:$0xff]  ;;  %v67_v10 = vlaneseq  ;;  %s102_s14 = sshll.u32 %s184_s1, 4  ;;  %s166_s16 = smov [#allocation6]   ;;  %s103_s14 = int_to_ptr.hbm [resolvable:$true] %s102_s14 }
   0x7   :  { %119 = vrcp.f32 %v38_v0  ;;  %v54_v3 = vand.u32 2147483648, %v38_v0  ;;  %v40_v5 = vld [vmem:[#allocation3 + $0x18] sm:$0xff]  ;;  %vm48_vm0 = vweird.f32 %v38_v0  ;;  %v52_v7 = vand.u32 2147483647, %v38_v0  ;;  %v36_v8 = vld [vmem:[#allocation3 + $0x8] sm:$0xff] }
   0x8   :  { %v41_v11 = vsub.f32 %v34_v4, %v40_v5  ;;  %v58_v13 = vmul.f32 0.01, %v36_v8  ;;  %v42_v14 = vadd.f32 1e-09, %v36_v8  ;;  %v68_v17 = vshrl.u32 %v67_v10, 7 }
   0x9   :  { %v55_v12 = vor.u32 1.1754944e-38, %v54_v3  ;;  %vm53_vm3 = vcmp.eq.f32.partialorder %v52_v7, 8.507059e+37  ;;  %v70_v22 = vand.u32 127, %v67_v10 }
   0xa   :  { %v59_v19 = vadd.f32 1.0, %v58_v13  ;;  %v60_v20 = vmul.f32 %v41_v11, %v41_v11  ;;  %v74_v23 = vmul.u32 128, %v68_v17 }
   0xc   :  { %v61_v24 = vmul.f32 %v60_v20, %v59_v19  ;;  %v75_v25 = vadd.s32 %v74_v23, %v70_v22 }
   0xd   :  { %v120_v1 = vpop.eup %119 }
   0xe   :  { %v44_v2 = vmul.f32 %v120_v1, %v38_v0  ;;  %vm49_vm1 = vweird.f32 %v120_v1  ;;  %vm76_vm4 = vcmp.lt.s32.totalorder %v75_v25, 8 }
   0xf   :  { %vm50_vm2 = vmor %vm48_vm0, %vm49_vm1 }
  0x10   :  { %v45_v6 = vsub.f32 1.0, %v44_v2 }
  0x12   :  { %v46_v9 = vmul.f32 %v120_v1, %v45_v6 }
  0x14   :  { %v47_v15 = vadd.f32 %v120_v1, %v46_v9 }
  0x16   :  { %v51_v16 = vsel %vm50_vm2, %v120_v1, %v47_v15 }
  0x17   :  { %v56_v18 = vsel %vm53_vm3, %v55_v12, %v51_v16 }
  0x18   :  { %v57_v21 = vmul.f32 %v56_v18, %v42_v14 }
  0x1a   :  { %121 = vlog2.f32 %v57_v21  ;;  %v62_v26 = vmul.f32 %v61_v24, %v57_v21 }
  0x20   :  { %v122_v27 = vpop.eup %121 }
  0x21   :  { %v64_v28 = vmul.f32 0.6931472, %v122_v27 }
  0x23   :  { %v65_v29 = vsub.f32 %v62_v26, %v64_v28 }
  0x25   :  { %v77_v30 = vsel %vm76_vm4, %v65_v29, 0.0 }
  0x26   :  { %86 = vadd.xlane.f32.xlu0 %v77_v30 }
  0x99   :  { %v87_v31 = vpop.xlane.xlu0 %86 }
  0x9a   :  { %v88_v32 = vrot.slane %v87_v31, 4 }
  0x9c   :  { %v89_v33 = vadd.f32 %v88_v32, %v87_v31 }
  0x9e   :  { %v90_v34 = vrot.slane %v89_v33, 2 }
  0xa0   :  { %v91_v35 = vadd.f32 %v90_v34, %v89_v33 }
  0xa2   :  { %v92_v36 = vrot.slane %v91_v35, 1 }
  0xa4   :  { %v93_v37 = vadd.f32 %v92_v36, %v91_v35 }
  0xa6   :  { %113 = vpush %v93_v37 }
  0xd7   :  { %s114_s15 = spop %113 }
  0xd8   :  { %96 = sst [smem:[#allocation6]] %s114_s15 }
  0xd9   :  { %105 = dma.smem_to_hbm %s166_s16, 16, %s103_s14, [#allocation5]  }
  0xda   :  { %161 = dma.done.wait [#allocation5], 16  }
  0xdb   :  { %162 = vsyncadd [#allocation5], 4294967280 }
  0xdc   :  { %110 = sfence }
  0xdd   :  { %111 = vsyncpa [#allocation4], 1 }
  0xde   :  { %112 = vsyncpa [#allocation5], 1 }

</bundles_post_ra>
